<compile_context>
chip_gen: v7x
topology: tpu7x:2x2x1
jax: 0.10.0
libtpu: 0.0.40
codegen_flags: <defaults>
</compile_context>

<pallas_src>
import functools

import numpy as np
import jax
import jax.numpy as jnp
from jax import lax
from jax.experimental import pallas as pl
from jax.experimental.pallas import tpu as pltpu

BATCH = 2
NUM_INPUTS = 6            # != NUM_CHANNELS[0] so block 0 exercises the 1x1 downsample
NUM_CHANNELS = (4, 4)     # two TemporalBlocks, dilations 1 and 2
KERNEL_SIZE = 2
SEQ_LEN = 8
BN_EPS = 1e-5

# Each TemporalBlock grows the length by 2*dilation (symmetric padding, k=2).
L_FINAL = SEQ_LEN + sum(2 * (2 ** i) for i in range(len(NUM_CHANNELS)))  # = 14

C_PAD = 8                 # channels padded to one f32 sublane tile
FRAME = 64                # per-sample frame width; BATCH*FRAME = 128 -> lane-dense
N_LANES = BATCH * FRAME   # 128
SLAB_COLS = 128           # parameter slab lane width (one full vreg tile)


# ----------------------------------------------------------------------------
# Deterministic synthetic parameters (PyTorch-shaped).
# ----------------------------------------------------------------------------
def init_params(key):
    keys = jax.random.split(key, 64)
    kit = iter(keys)

    def rnd(shape, scale=0.2):
        return (scale * jax.random.normal(next(kit), shape)).astype(jnp.float32)

    blocks = []
    in_c = NUM_INPUTS
    for i, out_c in enumerate(NUM_CHANNELS):
        blk = dict(
            d=2 ** i,
            conv1_w=rnd((out_c, in_c, KERNEL_SIZE)), conv1_b=rnd((out_c,)),
            bn1_gamma=1.0 + rnd((out_c,), 0.05), bn1_beta=rnd((out_c,)),
            bn1_mean=rnd((out_c,)), bn1_var=1.0 + jnp.abs(rnd((out_c,), 0.1)),
            conv2_w=rnd((out_c, out_c, KERNEL_SIZE)), conv2_b=rnd((out_c,)),
            bn2_gamma=1.0 + rnd((out_c,), 0.05), bn2_beta=rnd((out_c,)),
            bn2_mean=rnd((out_c,)), bn2_var=1.0 + jnp.abs(rnd((out_c,), 0.1)),
            ds_w=rnd((out_c, in_c, 1)) if in_c != out_c else None,
            ds_b=rnd((out_c,)) if in_c != out_c else None,
        )
        blocks.append(blk)
        in_c = out_c
    return blocks


# ----------------------------------------------------------------------------
# Pack every parameter into ONE (8,128)-tile-aligned f32 slab + a static plan.
# All channel dims are padded to C_PAD; every piece is a multiple of 8 rows and
# exactly SLAB_COLS lanes wide, so every in-kernel slice is tile-aligned.
# ----------------------------------------------------------------------------
def pack_params(blocks):
    pieces, plan = [], []
    row = 0

    def add(arr2d, rows_pad, cols_used):
        nonlocal row
        a = np.zeros((rows_pad, SLAB_COLS), np.float32)
        r, c = arr2d.shape
        a[:r, :c] = np.asarray(arr2d, np.float32)
        pieces.append(a)
        spec = (row, rows_pad, cols_used)        # static (offset, rows, cols)
        row += rows_pad
        return spec

    def fold_bn(gamma, beta, mean, var, conv_bias):
        gamma, beta, mean, var, conv_bias = (
            np.asarray(v, np.float32) for v in (gamma, beta, mean, var, conv_bias))
        scale = gamma / np.sqrt(var + BN_EPS)
        shift = beta - mean * scale + scale * conv_bias   # conv bias folded in
        return scale, shift

    def stack_taps(w):
        # (cout, cin, 2) -> (2*C_PAD, C_PAD): tap-0 rows on top, tap-1 rows below.
        w = np.asarray(w, np.float32)
        cout, cin, _ = w.shape
        ws = np.zeros((2 * C_PAD, C_PAD), np.float32)
        ws[:cout, :cin] = w[:, :, 0]
        ws[C_PAD:C_PAD + cout, :cin] = w[:, :, 1]
        return ws

    length = SEQ_LEN
    for blk in blocks:
        d = blk["d"]
        # Static invariant for the roll-based shifted tap: every sample's frame
        # tail must hold >= d zeros for BOTH convs of this block (worst case is
        # conv2 whose input length is length + d).
        assert FRAME >= length + 2 * d, (FRAME, length, d)

        s1, t1 = fold_bn(blk["bn1_gamma"], blk["bn1_beta"],
                         blk["bn1_mean"], blk["bn1_var"], blk["conv1_b"])
        s2, t2 = fold_bn(blk["bn2_gamma"], blk["bn2_beta"],
                         blk["bn2_mean"], blk["bn2_var"], blk["conv2_b"])
        entry = dict(
            d=d, l_in=length,
            w1=add(stack_taps(blk["conv1_w"]), 2 * C_PAD, C_PAD),
            s1=add(s1[:, None], C_PAD, 1), t1=add(t1[:, None], C_PAD, 1),
            w2=add(stack_taps(blk["conv2_w"]), 2 * C_PAD, C_PAD),
            s2=add(s2[:, None], C_PAD, 1), t2=add(t2[:, None], C_PAD, 1),
        )
        if blk["ds_w"] is not None:
            entry["ds_w"] = add(np.asarray(blk["ds_w"], np.float32)[:, :, 0],
                                C_PAD, C_PAD)
            entry["ds_b"] = add(np.asarray(blk["ds_b"], np.float32)[:, None],
                                C_PAD, 1)
        plan.append(entry)
        length = length + 2 * d

    slab = jnp.asarray(np.concatenate(pieces, axis=0))
    return slab, plan, length                     # length == L_FINAL


# ----------------------------------------------------------------------------
# The Pallas kernel: whole batch + whole TCN stack in one grid-less invocation.
#   x_ref : (B, C_in, L)         raw input, lane-packed once in-kernel
#   p_ref : (R, 128)             tile-aligned packed parameter slab
#   o_ref : (B, C_out, L_final)  final output, unpacked in-kernel
#   f_ref : (C_PAD, B*FRAME)     tiny scratch used only for the one-time
#                                lane pack / unpack of input and output
# ----------------------------------------------------------------------------
def _tcn_kernel(plan, x_ref, p_ref, o_ref, f_ref):
    # ---- one-time lane packing: (B, C_in, L) -> lane-dense frame (C_PAD, 128)
    f_ref[...] = jnp.zeros(f_ref.shape, jnp.float32)
    for b in range(BATCH):
        f_ref[0:NUM_INPUTS, b * FRAME:b * FRAME + SEQ_LEN] = x_ref[b]
    h = f_ref[...]

    # per-sample column index: used to keep each sample's padded tail exactly 0
    col = lax.broadcasted_iota(jnp.int32, (1, N_LANES), 1) % FRAME

    def sl(spec):                                  # static tile-aligned ref slice
        off, r, c = spec
        return p_ref[off:off + r, 0:c]

    def dconv(f, w, s, t, l_in, dil):
        # Dilated Conv1d (k=2, stride=1, pad=dil) + folded BN(+bias) + ReLU.
        # Both taps in ONE matmul (taps stacked on the OUTPUT rows); the dilated
        # shift of the tap-0 half is a lane roll.  Wrapped-in columns are zero
        # because every sample's frame tail holds >= dil zeros (asserted at
        # pack time), so no extra mask is needed for the wrap.
        y = jnp.dot(w, f, preferred_element_type=jnp.float32)   # (2*C_PAD, N)
        o = pltpu.roll(y[0:C_PAD, :], dil, axis=1) + y[C_PAD:2 * C_PAD, :]
        o = jnp.maximum(o * s + t, 0.0)            # BN (+conv bias) + ReLU
        return jnp.where(col < l_in + dil, o, 0.0)  # keep padded tail exactly 0

    for blk in plan:
        d, l0 = blk["d"], blk["l_in"]
        o1 = dconv(h, sl(blk["w1"]), sl(blk["s1"]), sl(blk["t1"]), l0, d)
        o2 = dconv(o1, sl(blk["w2"]), sl(blk["s2"]), sl(blk["t2"]), l0 + d, d)

        if "ds_w" in blk:                          # 1x1 downsample on the residual
            res = (jnp.dot(sl(blk["ds_w"]), h, preferred_element_type=jnp.float32)
                   + sl(blk["ds_b"]))
            res = jnp.where(col < l0, res, 0.0)    # bias only on valid columns
        else:
            res = h                                # tail already zero
        # residual is shorter than o2 by 2*d -> its zero tail IS the zero padding
        h = jnp.maximum(o2 + res, 0.0)

    # ---- one-time unpack: frame -> (B, C_out, L_final).  Go through the
    # scratch ref so the per-sample slices are plain (masked) ref loads/stores.
    f_ref[...] = h
    for b in range(BATCH):
        o_ref[b] = f_ref[0:NUM_CHANNELS[-1], b * FRAME:b * FRAME + L_FINAL]


# ----------------------------------------------------------------------------
# Wrapper: single grid-less pallas_call, no wrapper-side layout ops.
# ----------------------------------------------------------------------------
def tcn_forward(X, blocks):
    slab, plan, l_final = pack_params(blocks)
    c_out = NUM_CHANNELS[-1]
    kernel = functools.partial(_tcn_kernel, plan)

    flops = 2 * (2 * C_PAD) * C_PAD * N_LANES * 2 * len(plan)   # 4 conv matmuls
    flops += 2 * C_PAD * C_PAD * N_LANES                        # 1x1 downsample
    bytes_accessed = 4 * (X.size + slab.size + BATCH * c_out * l_final)

    # NOTE(v7x): grid-less call -> single TensorCore.  At these toy shapes that
    # is the right call; when scaling, add a batch / lane-chunk grid axis with
    # dimension_semantics=("parallel",) and re-derive sizes against 64 MiB VMEM.
    out = pl.pallas_call(
        kernel,
        out_shape=jax.ShapeDtypeStruct((BATCH, c_out, l_final), jnp.float32),
        in_specs=[pl.BlockSpec(memory_space=pltpu.MemorySpace.VMEM),
                  pl.BlockSpec(memory_space=pltpu.MemorySpace.VMEM)],
        out_specs=pl.BlockSpec(memory_space=pltpu.MemorySpace.VMEM),
        scratch_shapes=[pltpu.VMEM((C_PAD, N_LANES), jnp.float32)],
        cost_estimate=pl.CostEstimate(flops=int(flops), transcendentals=0,
                                      bytes_accessed=int(bytes_accessed)),
    )(X.astype(jnp.float32), slab)
    return out                                     # (B, C_out, L_FINAL)


# ----------------------------------------------------------------------------
# Pure-JAX reference (mirrors the PyTorch forward in eval mode).
# ----------------------------------------------------------------------------
def reference_forward(X, blocks):
    h = X.astype(jnp.float32)                      # (B, C, L) NCL
    for blk in blocks:
        d = blk["d"]

        def conv1d(z, w, bias):
            zp = jnp.pad(z, ((0, 0), (0, 0), (d, d)))
            lout = z.shape[2] + d
            out = (jnp.einsum("oi,bil->bol", w[:, :, 0], zp[:, :, :lout])
                   + jnp.einsum("oi,bil->bol", w[:, :, 1], zp[:, :, d:d + lout]))
            return out + bias[None, :, None]

        def bn(z, g, be, m, v):
            return (g[None, :, None] * (z - m[None, :, None])
                    / jnp.sqrt(v[None, :, None] + BN_EPS) + be[None, :, None])

        o = jax.nn.relu(bn(conv1d(h, blk["conv1_w"], blk["conv1_b"]),
                           blk["bn1_gamma"], blk["bn1_beta"],
                           blk["bn1_mean"], blk["bn1_var"]))
        o = jax.nn.relu(bn(conv1d(o, blk["conv2_w"], blk["conv2_b"]),
                           blk["bn2_gamma"], blk["bn2_beta"],
                           blk["bn2_mean"], blk["bn2_var"]))
        if blk["ds_w"] is not None:
            res = (jnp.einsum("oi,bil->bol", blk["ds_w"][:, :, 0], h)
                   + blk["ds_b"][None, :, None])
        else:
            res = h
        res = jnp.pad(res, ((0, 0), (0, 0), (0, o.shape[2] - res.shape[2])))
        h = jax.nn.relu(o + res)
    return h


if __name__ == "__main__":
    key = jax.random.PRNGKey(0)
    pkey, xkey = jax.random.split(key)
    blocks = init_params(pkey)
    # TCNFeatureExtractor forward input: (batch, num_inputs, seq_len) for Conv1d
    X = jax.random.normal(xkey, (BATCH, NUM_INPUTS, SEQ_LEN), dtype=jnp.float32)

    out = jax.block_until_ready(tcn_forward(X, blocks))
    ref = reference_forward(X, blocks)

    assert out.shape == (BATCH, NUM_CHANNELS[-1], L_FINAL), out.shape
    assert jnp.allclose(out, ref, atol=1e-3, rtol=1e-3), \
        float(jnp.max(jnp.abs(out - ref)))
    print("KERNEL_OK")
</pallas_src>

<mosaic_0001>
module attributes {stable_mosaic.version = 11 : i64} {
  func.func @_tcn_kernel(%arg0: memref<2x6x8xf32, #tpu.memory_space<vmem>>, %arg1: memref<144x128xf32, #tpu.memory_space<vmem>>, %arg2: memref<2x4x14xf32, #tpu.memory_space<vmem>>, %arg3: memref<8x128xf32, #tpu.memory_space<vmem>>) attributes {dimension_semantics = [], scalar_prefetch = 0 : i64, scratch_operands = 1 : i64, tpu.core_type = #tpu.core_type<tc>} {
    %cst = arith.constant 0.000000e+00 : f32
    %0 = vector.broadcast %cst : f32 to vector<8x128xf32>
    %c0 = arith.constant 0 : index
    %c0_0 = arith.constant 0 : index
    %1 = vector.load %arg3[%c0, %c0_0] : memref<8x128xf32, #tpu.memory_space<vmem>>, vector<8x128xf32>
    tpu.vector_store %arg3[%c0, %c0_0], %0 {strides = array<i32>} : memref<8x128xf32, #tpu.memory_space<vmem>>, vector<8x128xf32>,
    %c0_1 = arith.constant 0 : index
    %c0_2 = arith.constant 0 : index
    %c0_3 = arith.constant 0 : index
    %2 = vector.load %arg0[%c0_1, %c0_2, %c0_3] : memref<2x6x8xf32, #tpu.memory_space<vmem>>, vector<1x6x8xf32>
    %3 = vector.shape_cast %2 : vector<1x6x8xf32> to vector<6x8xf32>
    %c0_4 = arith.constant 0 : index
    %c0_5 = arith.constant 0 : index
    %4 = vector.load %arg3[%c0_4, %c0_5] : memref<8x128xf32, #tpu.memory_space<vmem>>, vector<6x8xf32>
    tpu.vector_store %arg3[%c0_4, %c0_5], %3 {strides = array<i32>} : memref<8x128xf32, #tpu.memory_space<vmem>>, vector<6x8xf32>,
    %c1 = arith.constant 1 : index
    %c0_6 = arith.constant 0 : index
    %c0_7 = arith.constant 0 : index
    %5 = vector.load %arg0[%c1, %c0_6, %c0_7] : memref<2x6x8xf32, #tpu.memory_space<vmem>>, vector<1x6x8xf32>
    %6 = vector.shape_cast %5 : vector<1x6x8xf32> to vector<6x8xf32>
    %c0_8 = arith.constant 0 : index
    %c64 = arith.constant 64 : index
    %7 = vector.load %arg3[%c0_8, %c64] : memref<8x128xf32, #tpu.memory_space<vmem>>, vector<6x8xf32>
    tpu.vector_store %arg3[%c0_8, %c64], %6 {strides = array<i32>} : memref<8x128xf32, #tpu.memory_space<vmem>>, vector<6x8xf32>,
    %c0_9 = arith.constant 0 : index
    %c0_10 = arith.constant 0 : index
    %8 = vector.load %arg3[%c0_9, %c0_10] : memref<8x128xf32, #tpu.memory_space<vmem>>, vector<8x128xf32>
    %9 = tpu.iota {dimensions = array<i32: 1>} : vector<1x128xi32>
    %c64_i32 = arith.constant 64 : i32
    %c0_i32 = arith.constant 0 : i32
    %10 = arith.cmpi eq, %c64_i32, %c0_i32 : i32
    %c1_i32 = arith.constant 1 : i32
    %11 = arith.select %10, %c1_i32, %c64_i32 : i32
    %12 = vector.broadcast %11 : i32 to vector<1x128xi32>
    %13 = arith.remsi %9, %12 : vector<1x128xi32>
    %c0_i32_11 = arith.constant 0 : i32
    %14 = vector.broadcast %c0_i32_11 : i32 to vector<1x128xi32>
    %15 = arith.cmpi ne, %13, %14 : vector<1x128xi32>
    %c0_i32_12 = arith.constant 0 : i32
    %16 = vector.broadcast %c0_i32_12 : i32 to vector<1x128xi32>
    %17 = arith.cmpi slt, %13, %16 : vector<1x128xi32>
    %c0_i32_13 = arith.constant 0 : i32
    %18 = arith.cmpi slt, %11, %c0_i32_13 : i32
    %19 = vector.broadcast %18 : i1 to vector<1x128xi1>
    %20 = vector.broadcast %19 : vector<1x128xi1> to vector<1x128xi1>
    %21 = arith.xori %17, %20 : vector<1x128xi1>
    %22 = arith.andi %21, %15 : vector<1x128xi1>
    %23 = vector.broadcast %11 : i32 to vector<1x128xi32>
    %24 = arith.addi %13, %23 : vector<1x128xi32>
    %25 = arith.select %22, %24, %13 : vector<1x128xi1>, vector<1x128xi32>
    %c0_14 = arith.constant 0 : index
    %c0_15 = arith.constant 0 : index
    %26 = vector.load %arg1[%c0_14, %c0_15] : memref<144x128xf32, #tpu.memory_space<vmem>>, vector<16x8xf32>
    %c16 = arith.constant 16 : index
    %c0_16 = arith.constant 0 : index
    %27 = vector.load %arg1[%c16, %c0_16] : memref<144x128xf32, #tpu.memory_space<vmem>>, vector<8x1xf32>
    %c24 = arith.constant 24 : index
    %c0_17 = arith.constant 0 : index
    %28 = vector.load %arg1[%c24, %c0_17] : memref<144x128xf32, #tpu.memory_space<vmem>>, vector<8x1xf32>
    %cst_18 = arith.constant dense<0.000000e+00> : vector<16x128xf32>
    %29 = tpu.matmul %26, %8, %cst_18 {dimension_numbers = #tpu.dot_dimension_numbers<[1], [0], [0], [1], [0, 0, 1, 1], [], []>} : vector<16x8xf32>, vector<8x128xf32>, vector<16x128xf32> -> vector<16x128xf32>
    %30 = vector.extract_strided_slice %29 {offsets = [0, 0], sizes = [8, 128], strides = [1, 1]} : vector<16x128xf32> to vector<8x128xf32>
    %c1_i32_19 = arith.constant 1 : i32
    %31 = tpu.dynamic_rotate %30 by %c1_i32_19 dim 1 : vector<8x128xf32>, i32 -> vector<8x128xf32>
    %32 = vector.extract_strided_slice %29 {offsets = [8, 0], sizes = [8, 128], strides = [1, 1]} : vector<16x128xf32> to vector<8x128xf32>
    %33 = arith.addf %31, %32 : vector<8x128xf32>
    %34 = vector.broadcast %27 : vector<8x1xf32> to vector<8x128xf32>
    %35 = arith.mulf %33, %34 : vector<8x128xf32>
    %36 = vector.broadcast %28 : vector<8x1xf32> to vector<8x128xf32>
    %37 = arith.addf %35, %36 : vector<8x128xf32>
    %cst_20 = arith.constant 0.000000e+00 : f32
    %38 = vector.broadcast %cst_20 : f32 to vector<8x128xf32>
    %39 = arith.maximumf %37, %38 : vector<8x128xf32>
    %c9_i32 = arith.constant 9 : i32
    %40 = vector.broadcast %c9_i32 : i32 to vector<1x128xi32>
    %41 = arith.cmpi slt, %25, %40 : vector<1x128xi32>
    %cst_21 = arith.constant 0.000000e+00 : f32
    %42 = vector.shape_cast %41 : vector<1x128xi1> to vector<1x128xi1>
    %43 = vector.broadcast %42 : vector<1x128xi1> to vector<8x128xi1>
    %44 = vector.broadcast %cst_21 : f32 to vector<8x128xf32>
    %45 = arith.select %43, %39, %44 : vector<8x128xi1>, vector<8x128xf32>
    %c32 = arith.constant 32 : index
    %c0_22 = arith.constant 0 : index
    %46 = vector.load %arg1[%c32, %c0_22] : memref<144x128xf32, #tpu.memory_space<vmem>>, vector<16x8xf32>
    %c48 = arith.constant 48 : index
    %c0_23 = arith.constant 0 : index
    %47 = vector.load %arg1[%c48, %c0_23] : memref<144x128xf32, #tpu.memory_space<vmem>>, vector<8x1xf32>
    %c56 = arith.constant 56 : index
    %c0_24 = arith.constant 0 : index
    %48 = vector.load %arg1[%c56, %c0_24] : memref<144x128xf32, #tpu.memory_space<vmem>>, vector<8x1xf32>
    %cst_25 = arith.constant dense<0.000000e+00> : vector<16x128xf32>
    %49 = tpu.matmul %46, %45, %cst_25 {dimension_numbers = #tpu.dot_dimension_numbers<[1], [0], [0], [1], [0, 0, 1, 1], [], []>} : vector<16x8xf32>, vector<8x128xf32>, vector<16x128xf32> -> vector<16x128xf32>
    %50 = vector.extract_strided_slice %49 {offsets = [0, 0], sizes = [8, 128], strides = [1, 1]} : vector<16x128xf32> to vector<8x128xf32>
    %c1_i32_26 = arith.constant 1 : i32
    %51 = tpu.dynamic_rotate %50 by %c1_i32_26 dim 1 : vector<8x128xf32>, i32 -> vector<8x128xf32>
    %52 = vector.extract_strided_slice %49 {offsets = [8, 0], sizes = [8, 128], strides = [1, 1]} : vector<16x128xf32> to vector<8x128xf32>
    %53 = arith.addf %51, %52 : vector<8x128xf32>
    %54 = vector.broadcast %47 : vector<8x1xf32> to vector<8x128xf32>
    %55 = arith.mulf %53, %54 : vector<8x128xf32>
    %56 = vector.broadcast %48 : vector<8x1xf32> to vector<8x128xf32>
    %57 = arith.addf %55, %56 : vector<8x128xf32>
    %cst_27 = arith.constant 0.000000e+00 : f32
    %58 = vector.broadcast %cst_27 : f32 to vector<8x128xf32>
    %59 = arith.maximumf %57, %58 : vector<8x128xf32>
    %c10_i32 = arith.constant 10 : i32
    %60 = vector.broadcast %c10_i32 : i32 to vector<1x128xi32>
    %61 = arith.cmpi slt, %25, %60 : vector<1x128xi32>
    %cst_28 = arith.constant 0.000000e+00 : f32
    %62 = vector.shape_cast %61 : vector<1x128xi1> to vector<1x128xi1>
    %63 = vector.broadcast %62 : vector<1x128xi1> to vector<8x128xi1>
    %64 = vector.broadcast %cst_28 : f32 to vector<8x128xf32>
    %65 = arith.select %63, %59, %64 : vector<8x128xi1>, vector<8x128xf32>
    %c64_29 = arith.constant 64 : index
    %c0_30 = arith.constant 0 : index
    %66 = vector.load %arg1[%c64_29, %c0_30] : memref<144x128xf32, #tpu.memory_space<vmem>>, vector<8x8xf32>
    %cst_31 = arith.constant dense<0.000000e+00> : vector<8x128xf32>
    %67 = tpu.matmul %66, %8, %cst_31 {dimension_numbers = #tpu.dot_dimension_numbers<[1], [0], [0], [1], [0, 0, 1, 1], [], []>} : vector<8x8xf32>, vector<8x128xf32>, vector<8x128xf32> -> vector<8x128xf32>
    %c72 = arith.constant 72 : index
    %c0_32 = arith.constant 0 : index
    %68 = vector.load %arg1[%c72, %c0_32] : memref<144x128xf32, #tpu.memory_space<vmem>>, vector<8x1xf32>
    %69 = vector.broadcast %68 : vector<8x1xf32> to vector<8x128xf32>
    %70 = arith.addf %67, %69 : vector<8x128xf32>
    %c8_i32 = arith.constant 8 : i32
    %71 = vector.broadcast %c8_i32 : i32 to vector<1x128xi32>
    %72 = arith.cmpi slt, %25, %71 : vector<1x128xi32>
    %cst_33 = arith.constant 0.000000e+00 : f32
    %73 = vector.shape_cast %72 : vector<1x128xi1> to vector<1x128xi1>
    %74 = vector.broadcast %73 : vector<1x128xi1> to vector<8x128xi1>
    %75 = vector.broadcast %cst_33 : f32 to vector<8x128xf32>
    %76 = arith.select %74, %70, %75 : vector<8x128xi1>, vector<8x128xf32>
    %77 = arith.addf %65, %76 : vector<8x128xf32>
    %cst_34 = arith.constant 0.000000e+00 : f32
    %78 = vector.broadcast %cst_34 : f32 to vector<8x128xf32>
    %79 = arith.maximumf %77, %78 : vector<8x128xf32>
    %c80 = arith.constant 80 : index
    %c0_35 = arith.constant 0 : index
    %80 = vector.load %arg1[%c80, %c0_35] : memref<144x128xf32, #tpu.memory_space<vmem>>, vector<16x8xf32>
    %c96 = arith.constant 96 : index
    %c0_36 = arith.constant 0 : index
    %81 = vector.load %arg1[%c96, %c0_36] : memref<144x128xf32, #tpu.memory_space<vmem>>, vector<8x1xf32>
    %c104 = arith.constant 104 : index
    %c0_37 = arith.constant 0 : index
    %82 = vector.load %arg1[%c104, %c0_37] : memref<144x128xf32, #tpu.memory_space<vmem>>, vector<8x1xf32>
    %cst_38 = arith.constant dense<0.000000e+00> : vector<16x128xf32>
    %83 = tpu.matmul %80, %79, %cst_38 {dimension_numbers = #tpu.dot_dimension_numbers<[1], [0], [0], [1], [0, 0, 1, 1], [], []>} : vector<16x8xf32>, vector<8x128xf32>, vector<16x128xf32> -> vector<16x128xf32>
    %84 = vector.extract_strided_slice %83 {offsets = [0, 0], sizes = [8, 128], strides = [1, 1]} : vector<16x128xf32> to vector<8x128xf32>
    %c2_i32 = arith.constant 2 : i32
    %85 = tpu.dynamic_rotate %84 by %c2_i32 dim 1 : vector<8x128xf32>, i32 -> vector<8x128xf32>
    %86 = vector.extract_strided_slice %83 {offsets = [8, 0], sizes = [8, 128], strides = [1, 1]} : vector<16x128xf32> to vector<8x128xf32>
    %87 = arith.addf %85, %86 : vector<8x128xf32>
    %88 = vector.broadcast %81 : vector<8x1xf32> to vector<8x128xf32>
    %89 = arith.mulf %87, %88 : vector<8x128xf32>
    %90 = vector.broadcast %82 : vector<8x1xf32> to vector<8x128xf32>
    %91 = arith.addf %89, %90 : vector<8x128xf32>
    %cst_39 = arith.constant 0.000000e+00 : f32
    %92 = vector.broadcast %cst_39 : f32 to vector<8x128xf32>
    %93 = arith.maximumf %91, %92 : vector<8x128xf32>
    %c12_i32 = arith.constant 12 : i32
    %94 = vector.broadcast %c12_i32 : i32 to vector<1x128xi32>
    %95 = arith.cmpi slt, %25, %94 : vector<1x128xi32>
    %cst_40 = arith.constant 0.000000e+00 : f32
    %96 = vector.shape_cast %95 : vector<1x128xi1> to vector<1x128xi1>
    %97 = vector.broadcast %96 : vector<1x128xi1> to vector<8x128xi1>
    %98 = vector.broadcast %cst_40 : f32 to vector<8x128xf32>
    %99 = arith.select %97, %93, %98 : vector<8x128xi1>, vector<8x128xf32>
    %c112 = arith.constant 112 : index
    %c0_41 = arith.constant 0 : index
    %100 = vector.load %arg1[%c112, %c0_41] : memref<144x128xf32, #tpu.memory_space<vmem>>, vector<16x8xf32>
    %c128 = arith.constant 128 : index
    %c0_42 = arith.constant 0 : index
    %101 = vector.load %arg1[%c128, %c0_42] : memref<144x128xf32, #tpu.memory_space<vmem>>, vector<8x1xf32>
    %c136 = arith.constant 136 : index
    %c0_43 = arith.constant 0 : index
    %102 = vector.load %arg1[%c136, %c0_43] : memref<144x128xf32, #tpu.memory_space<vmem>>, vector<8x1xf32>
    %cst_44 = arith.constant dense<0.000000e+00> : vector<16x128xf32>
    %103 = tpu.matmul %100, %99, %cst_44 {dimension_numbers = #tpu.dot_dimension_numbers<[1], [0], [0], [1], [0, 0, 1, 1], [], []>} : vector<16x8xf32>, vector<8x128xf32>, vector<16x128xf32> -> vector<16x128xf32>
    %104 = vector.extract_strided_slice %103 {offsets = [0, 0], sizes = [8, 128], strides = [1, 1]} : vector<16x128xf32> to vector<8x128xf32>
    %c2_i32_45 = arith.constant 2 : i32
    %105 = tpu.dynamic_rotate %104 by %c2_i32_45 dim 1 : vector<8x128xf32>, i32 -> vector<8x128xf32>
    %106 = vector.extract_strided_slice %103 {offsets = [8, 0], sizes = [8, 128], strides = [1, 1]} : vector<16x128xf32> to vector<8x128xf32>
    %107 = arith.addf %105, %106 : vector<8x128xf32>
    %108 = vector.broadcast %101 : vector<8x1xf32> to vector<8x128xf32>
    %109 = arith.mulf %107, %108 : vector<8x128xf32>
    %110 = vector.broadcast %102 : vector<8x1xf32> to vector<8x128xf32>
    %111 = arith.addf %109, %110 : vector<8x128xf32>
    %cst_46 = arith.constant 0.000000e+00 : f32
    %112 = vector.broadcast %cst_46 : f32 to vector<8x128xf32>
    %113 = arith.maximumf %111, %112 : vector<8x128xf32>
    %c14_i32 = arith.constant 14 : i32
    %114 = vector.broadcast %c14_i32 : i32 to vector<1x128xi32>
    %115 = arith.cmpi slt, %25, %114 : vector<1x128xi32>
    %cst_47 = arith.constant 0.000000e+00 : f32
    %116 = vector.shape_cast %115 : vector<1x128xi1> to vector<1x128xi1>
    %117 = vector.broadcast %116 : vector<1x128xi1> to vector<8x128xi1>
    %118 = vector.broadcast %cst_47 : f32 to vector<8x128xf32>
    %119 = arith.select %117, %113, %118 : vector<8x128xi1>, vector<8x128xf32>
    %120 = arith.addf %119, %79 : vector<8x128xf32>
    %cst_48 = arith.constant 0.000000e+00 : f32
    %121 = vector.broadcast %cst_48 : f32 to vector<8x128xf32>
    %122 = arith.maximumf %120, %121 : vector<8x128xf32>
    %c0_49 = arith.constant 0 : index
    %c0_50 = arith.constant 0 : index
    %123 = vector.load %arg3[%c0_49, %c0_50] : memref<8x128xf32, #tpu.memory_space<vmem>>, vector<8x128xf32>
    tpu.vector_store %arg3[%c0_49, %c0_50], %122 {strides = array<i32>} : memref<8x128xf32, #tpu.memory_space<vmem>>, vector<8x128xf32>,
    %c0_51 = arith.constant 0 : index
    %c0_52 = arith.constant 0 : index
    %124 = vector.load %arg3[%c0_51, %c0_52] : memref<8x128xf32, #tpu.memory_space<vmem>>, vector<4x14xf32>
    %c0_53 = arith.constant 0 : index
    %c0_54 = arith.constant 0 : index
    %c0_55 = arith.constant 0 : index
    %125 = vector.load %arg2[%c0_53, %c0_54, %c0_55] : memref<2x4x14xf32, #tpu.memory_space<vmem>>, vector<1x4x14xf32>
    %126 = vector.shape_cast %125 : vector<1x4x14xf32> to vector<4x14xf32>
    %127 = vector.shape_cast %124 : vector<4x14xf32> to vector<1x4x14xf32>
    tpu.vector_store %arg2[%c0_53, %c0_54, %c0_55], %127 {strides = array<i32>} : memref<2x4x14xf32, #tpu.memory_space<vmem>>, vector<1x4x14xf32>,
    %c0_56 = arith.constant 0 : index
    %c64_57 = arith.constant 64 : index
    %128 = vector.load %arg3[%c0_56, %c64_57] : memref<8x128xf32, #tpu.memory_space<vmem>>, vector<4x14xf32>
    %c1_58 = arith.constant 1 : index
    %c0_59 = arith.constant 0 : index
    %c0_60 = arith.constant 0 : index
    %129 = vector.load %arg2[%c1_58, %c0_59, %c0_60] : memref<2x4x14xf32, #tpu.memory_space<vmem>>, vector<1x4x14xf32>
    %130 = vector.shape_cast %129 : vector<1x4x14xf32> to vector<4x14xf32>
    %131 = vector.shape_cast %128 : vector<4x14xf32> to vector<1x4x14xf32>
    tpu.vector_store %arg2[%c1_58, %c0_59, %c0_60], %131 {strides = array<i32>} : memref<2x4x14xf32, #tpu.memory_space<vmem>>, vector<1x4x14xf32>,
    return
  }
}

</mosaic_0001>

<bundles_post_ra>
// kernel: tpu_custom_call.1
= control target key start
LH: loop header
LB: loop body
LE: loop exit
PB: predicated region body
PF: predicated region fallthrough
CT: control target
= control target key end

     0   :  { %7 = vsyncpa [#allocation4], 0  ;;  %s778_s0 = inlined_call_operand.vmem [shape: f32[2,6,8], index: 0, kind: input, shape index: {}]   ;;  %s779_s1 = inlined_call_operand.hbm [shape: f32[144,128], index: 1, kind: input, shape index: {}]   ;;  %s780_s2 = inlined_call_operand.hbm [shape: f32[2,4,14], index: 2, kind: output, shape index: {}]  }
   0x1   :  { %8 = vsyncpa [#allocation5], 0  ;;  %s702_s9 = smov [#allocation3]   ;;  %s654_s13 = scalar_lea.hbm %s779_s1, 2304 }
   0x2   :  { %s16_s10 = sshll.u32 %s702_s9, 4  ;;  %p655_p0 = scmp.ne.s32.totalorder %s779_s1, %s654_s13  ;;  %s17_s10 = int_to_ptr.vmem [resolvable:$true] %s16_s10 }
   0x3   :  { %p658_p1 = scmp.lt.u32.totalorder %s654_s13, %s779_s1 }
   0x5   :  { %p660_p2 = pnand %p658_p1, %p655_p0 }
   0x7   :  { %663 = shalt.err (!%p660_p2)
}
   0x8   :  { %s664_s18 = scalar_lea.vmem %s17_s10, 2304  ;;  %p669_p4 = scmp.lt.s32.totalorder %s17_s10, %s17_s10 }
   0x9   :  { %p665_p3 = scmp.ne.s32.totalorder %s17_s10, %s664_s18  ;;  %p670_p5 = scmp.lt.s32.totalorder %s664_s18, %s664_s18 }
   0xb   :  { %p671_p6 = por %p670_p5, %p669_p4 }
   0xd   :  { %p672_p7 = pnand %p671_p6, %p665_p3 }
   0xf   :  { %675 = shalt.err (!%p672_p7)
}
  0x10   :  { %s703_s19 = smov 128   ;;  %s704_s20 = smov 8  }
  0x11   :  { %22 = dma.hbm_to_vmem [thread:$0]  %s779_s1, 2304, %s17_s10, [#allocation4], %s703_s19, %s703_s19, %s704_s20  }
  0x12   :  { %698 = dma.done.wait [#allocation4], 2304  }
  0x13   :  { %699 = vsyncadd [#allocation4], 4294964992  ;;  %v705_v0 = vmov 0.0   ;;  %vm28_vm0 = vcmask 62464   ;;  %vm57_vm1 = vcmask 64512   ;;  %v53_v3 = vld [vmem:[#allocation3] sm:$0xff]  ;;  %v39_v21 = vlaneseq }
  0x14   :  { %26 = vst [vmem:[#allocation2] sm:$0xff] %v705_v0  ;;  %v590_v1 = vld [vmem:[%s778_s0 + $0x8] sm:$0x3f]  ;;  %v27_v2 = vld [vmem:[%s778_s0] sm:$0x3f]  ;;  %s706_s27 = smov 64   ;;  %618 = vmatprep.mubr.msk.f32.mxu0 %vm57_vm1, %v53_v3 }
  0x15   :  { %33 = vrot.lane.b32.xlu0 %v590_v1, %s706_s27  ;;  %29 = vst.msk [vmem:[#allocation2] sm:$0x3f] %vm28_vm0, %v27_v2  ;;  %v56_v4 = vld [vmem:[#allocation3 + $0x18] sm:$0xff]  ;;  %v55_v5 = vld [vmem:[#allocation3 + $0x10] sm:$0xff]  ;;  %v707_v6 = vmov 0   ;;  %vm36_vm2 = vcmask 587264  }
  0x16   :  { %653 = vset.pattern.permute.xlu1 %v707_v6  ;;  %652 = vset.pattern.permute.xlu0 %v707_v6  ;;  %v162_v7 = vld [vmem:[#allocation3 + $0x38] sm:$0xff]  ;;  %v54_v10 = vld [vmem:[#allocation3 + $0x8] sm:$0xff]  ;;  %vm708_vm3 = vmmov 0   ;;  %v264_v11 = vld [vmem:[#allocation3 + $0x40] sm:$0xff]  ;;  %s709_s0 = smov 1   ;;  %v40_v22 = vand.u32 127, %v39_v21 }
  0x17   :  { %150 = vperm.xlu1 %653, %v56_v4   ;;  %v159_v12 = vld [vmem:[#allocation3 + $0x20] sm:$0xff]  ;;  %v161_v15 = vld [vmem:[#allocation3 + $0x30] sm:$0xff]  ;;  %v265_v16 = vld [vmem:[#allocation3 + $0x48] sm:$0xff]  ;;  %s710_s1 = smov 2   ;;  %vm564_vm9 = vcmask 109568   ;;  %s711_s28 = smov [#allocation6]  }
  0x18   :  { %623 = vmatprep.mubr.msk.f32.mxu1 %vm57_vm1, %v159_v12  ;;  %v352_v19 = vld [vmem:[#allocation3 + $0x60] sm:$0xff]  ;;  %v751_v26 = vand.u32 63, %v40_v22  ;;  %v160_v30 = vld [vmem:[#allocation3 + $0x28] sm:$0xff]  ;;  %v350_v33 = vld [vmem:[#allocation3 + $0x50] sm:$0xff]  ;;  %s578_s29 = sshll.u32 %s711_s28, 4  ;;  %s579_s29 = int_to_ptr.vmem [resolvable:$true] %s578_s29 }
  0x19   :  { %144 = vperm.xlu0 %652, %v55_v5   ;;  %v353_v34 = vld [vmem:[#allocation3 + $0x68] sm:$0xff]  ;;  %v457_v35 = vld [vmem:[#allocation3 + $0x80] sm:$0xff]  ;;  %v351_v49 = vld [vmem:[#allocation3 + $0x58] sm:$0xff]  ;;  %s676_s30 = scalar_lea.vmem %s579_s29, 128  ;;  %p681_p9 = scmp.lt.s32.totalorder %s579_s29, %s579_s29 }
  0x1a   :  { %vm155_vm4 = vcmp.lt.s32.totalorder %v751_v26, 9  ;;  %vm344_vm5 = vcmp.lt.s32.totalorder %v751_v26, 8  ;;  %vm260_vm6 = vcmp.lt.s32.totalorder %v751_v26, 10  ;;  %v455_v50 = vld [vmem:[#allocation3 + $0x70] sm:$0xff]  ;;  %v458_v53 = vld [vmem:[#allocation3 + $0x88] sm:$0xff]  ;;  %vm451_vm7 = vcmp.lt.s32.totalorder %v751_v26, 12  ;;  %p677_p8 = scmp.ne.s32.totalorder %s579_s29, %s676_s30  ;;  %p682_p10 = scmp.lt.s32.totalorder %s676_s30, %s676_s30 }
  0x1b   :  { %v456_v61 = vld [vmem:[#allocation3 + $0x78] sm:$0xff]  ;;  %vm556_vm8 = vcmp.lt.s32.totalorder %v751_v26, 14 }
  0x1c   :  { %p683_p11 = por %p682_p10, %p681_p9 }
  0x1d   :  { %255 = vperm.xlu0 %652, %v162_v7  }
  0x1e   :  { %p684_p12 = pnand %p683_p11, %p677_p8 }
  0x87   :  { %v34_v8 = vpop.permute.xlu0 %33 }
  0x88   :  { %37 = vst.msk [vmem:[#allocation2] sm:$0x3f] %vm36_vm2, %v34_v8 }
  0x8f   :  { %v38_v9 = vld [vmem:[#allocation2] sm:$0xff] }
  0x90   :  { %616 = vmatprep.subr.mxu0 %v38_v9 }
  0x91   :  { %617 = vmatpush3.msra.mxu0 %v38_v9 }
  0x92   :  { %619 = vmatmul.mubr.msk.f32.vlgmr.msra.gmra.mrb[0].mxu0 %vm57_vm1, %v54_v10  ;;  %626 = vmatprep.subr.mxu0 %v705_v0 }
  0x93   :  { %627 = vmatpush3.msra.mxu0 %v38_v9  ;;  %628 = vmatprep.mubr.msk.f32.mxu0 %vm708_vm3, %v705_v0 }
  0x96   :  { %629 = vmatmul.mubr.msk.f32.vlgmr.msra.gmra.mrb[2].mxu0 %vm57_vm1, %v264_v11  ;;  %v151_v20 = vpop.permute.xlu1 %150 }
  0x97   :  { %638 = vmatprep.mubr.msk.f32.mxu0 %vm57_vm1, %v455_v50 }
  0x98   :  { %v145_v25 = vpop.permute.xlu0 %144 }
  0x9c   :  { %v256_v36 = vpop.permute.xlu0 %255 }
 0x165   :  { %v620_v13 = vpop.f32.mrb[0].mxu0 }
 0x166   :  { %v130_v14 = vpop.f32.mrb[1].mxu0 }
 0x167   :  { %139 = vrot.lane.b32.xlu1 %v130_v14, %s709_s0 }
 0x169   :  { %v340_v17 = vpop.f32.mrb[2].mxu0 }
 0x16a   :  { %v630_v18 = vpop.f32.mrb[3].mxu0 }
 0x16b   :  { %249 = vperm.xlu1 %653, %v161_v15  }
 0x16f   :  { %268 = vperm.xlu1 %653, %v265_v16  }
 0x173   :  { %440 = vperm.xlu1 %653, %v352_v19  }
 0x1d9   :  { %v140_v23 = vpop.permute.xlu1 %139 }
 0x1da   :  { %v141_v24 = vadd.f32 %v620_v13, %v140_v23 }
 0x1dc   :  { %v147_v27 = vmul.f32 %v145_v25, %v141_v24 }
 0x1de   :  { %v153_v28 = vadd.f32 %v151_v20, %v147_v27 }
 0x1e0   :  { %v154_v29 = vmax.f32 %v153_v28, 0.0 }
 0x1e2   :  { %621 = vmatprep.subr.msk.mxu1 %vm155_vm4, %v154_v29 }
 0x1e3   :  { %622 = vmatpush3.msk.msra.mxu1 %vm155_vm4, %v154_v29 }
 0x1e4   :  { %624 = vmatmul.mubr.msk.f32.vlgmr.msra.gmra.mrb[0].mxu1 %vm57_vm1, %v160_v30 }
 0x1e5   :  { %633 = vmatprep.mubr.msk.f32.mxu1 %vm57_vm1, %v350_v33 }
 0x1ea   :  { %v250_v37 = vpop.permute.xlu1 %249 }
 0x1ee   :  { %v269_v40 = vpop.permute.xlu1 %268 }
 0x1ef   :  { %v341_v42 = vadd.f32 %v340_v17, %v269_v40 }
 0x1f1   :  { %v347_v45 = vsel %vm344_vm5, %v341_v42, 0.0 }
 0x1f2   :  { %v441_v54 = vpop.permute.xlu1 %440 }
 0x2b7   :  { %v625_v31 = vpop.f32.mrb[0].mxu1 }
 0x2b8   :  { %v235_v32 = vpop.f32.mrb[1].mxu1 }
 0x2b9   :  { %244 = vrot.lane.b32.xlu0 %v235_v32, %s709_s0 }
 0x2bd   :  { %446 = vperm.xlu0 %652, %v353_v34  }
 0x2c1   :  { %545 = vperm.xlu0 %652, %v457_v35  }
 0x32b   :  { %v245_v38 = vpop.permute.xlu0 %244 }
 0x32c   :  { %v246_v39 = vadd.f32 %v625_v31, %v245_v38 }
 0x32e   :  { %v252_v41 = vmul.f32 %v250_v37, %v246_v39 }
 0x330   :  { %v258_v43 = vadd.f32 %v256_v36, %v252_v41 }
 0x332   :  { %v259_v44 = vmax.f32 %v258_v43, 0.0 }
 0x334   :  { %v263_v46 = vsel %vm260_vm6, %v259_v44, 0.0 }
 0x335   :  { %v348_v47 = vadd.f32 %v347_v45, %v263_v46 }
 0x337   :  { %v349_v48 = vmax.f32 %v348_v47, 0.0 }
 0x339   :  { %631 = vmatprep.subr.mxu1 %v349_v48 }
 0x33a   :  { %632 = vmatpush3.msra.mxu1 %v349_v48 }
 0x33b   :  { %634 = vmatmul.mubr.msk.f32.vlgmr.msra.gmra.mrb[2].mxu1 %vm57_vm1, %v351_v49 }
 0x33c   :  { %v447_v58 = vpop.permute.xlu0 %446 }
 0x340   :  { %v546_v0 = vpop.permute.xlu0 %545 }
 0x40e   :  { %v635_v51 = vpop.f32.mrb[2].mxu1 }
 0x40f   :  { %v426_v52 = vpop.f32.mrb[3].mxu1 }
 0x410   :  { %435 = vrot.lane.b32.xlu1 %v426_v52, %s710_s1 }
 0x414   :  { %551 = vperm.xlu1 %653, %v458_v53  }
 0x482   :  { %v436_v55 = vpop.permute.xlu1 %435 }
 0x483   :  { %v437_v56 = vadd.f32 %v635_v51, %v436_v55 }
 0x485   :  { %v443_v57 = vmul.f32 %v441_v54, %v437_v56 }
 0x487   :  { %v449_v59 = vadd.f32 %v447_v58, %v443_v57 }
 0x489   :  { %v450_v60 = vmax.f32 %v449_v59, 0.0 }
 0x48b   :  { %636 = vmatprep.subr.msk.mxu0 %vm451_vm7, %v450_v60 }
 0x48c   :  { %637 = vmatpush3.msk.msra.mxu0 %vm451_vm7, %v450_v60 }
 0x48d   :  { %639 = vmatmul.mubr.msk.f32.vlgmr.msra.gmra.mrb[4].mxu0 %vm57_vm1, %v456_v61 }
 0x493   :  { %v552_v4 = vpop.permute.xlu1 %551 }
 0x560   :  { %v640_v62 = vpop.f32.mrb[4].mxu0 }
 0x561   :  { %v531_v63 = vpop.f32.mrb[5].mxu0 }
 0x562   :  { %540 = vrot.lane.b32.xlu0 %v531_v63, %s710_s1 }
 0x5d4   :  { %v541_v1 = vpop.permute.xlu0 %540 }
 0x5d5   :  { %v542_v2 = vadd.f32 %v640_v62, %v541_v1 }
 0x5d7   :  { %v548_v3 = vmul.f32 %v546_v0, %v542_v2 }
 0x5d9   :  { %v554_v5 = vadd.f32 %v552_v4, %v548_v3 }
 0x5db   :  { %v555_v6 = vmax.f32 %v554_v5, 0.0 }
 0x5dd   :  { %v559_v7 = vsel %vm556_vm8, %v555_v6, 0.0 }
 0x5de   :  { %v560_v8 = vadd.f32 %v559_v7, %v349_v48 }
 0x5e0   :  { %v561_v9 = vmax.f32 %v560_v8, 0.0 }
 0x5e2   :  { %562 = vst [vmem:[#allocation2] sm:$0xff] %v561_v9 }
 0x5e9   :  { %v566_v10 = vld [vmem:[#allocation2] sm:$0xf] }
 0x5ea   :  { %v563_v11 = vld [vmem:[#allocation2] sm:$0xf]  ;;  %568 = vrot.lane.b32.xlu1 %v566_v10, %s706_s27 }
 0x5eb   :  { %565 = vst.msk [vmem:[#allocation6] sm:$0xf] %vm564_vm9, %v563_v11 }
 0x65c   :  { %v569_v12 = vpop.permute.xlu1 %568 }
 0x65d   :  { %572 = vst.msk [vmem:[#allocation6 + $0x4] sm:$0xf] %vm564_vm9, %v569_v12 }
 0x65e   :  { %687 = shalt.err (!%p684_p12)
}
 0x65f   :  { %s688_s5 = scalar_lea.hbm %s780_s2, 128 }
 0x660   :  { %p689_p13 = scmp.ne.s32.totalorder %s780_s2, %s688_s5  ;;  %p692_p0 = scmp.lt.u32.totalorder %s688_s5, %s780_s2 }
 0x662   :  { %p694_p1 = pnand %p692_p0, %p689_p13 }
 0x664   :  { %697 = shalt.err (!%p694_p1)
}
 0x665   :  { %s712_s10 = smov 4  }
 0x666   :  { %584 = dma.vmem_to_hbm [thread:$0]  %s579_s29, 128, %s780_s2, [#allocation5], %s706_s27, %s706_s27, %s712_s10  }
 0x667   :  { %700 = dma.done.wait [#allocation5], 128  }
 0x668   :  { %701 = vsyncadd [#allocation5], 4294967168 }
 0x669   :  { %588 = vsyncpa [#allocation4], 1 }
 0x66a   :  { %589 = vsyncpa [#allocation5], 1 }

</bundles_post_ra>
